<compile_context>
chip_gen: v6e
topology: v6e:2x2x1
jax: 0.10.0
libtpu: 0.0.40
codegen_flags: <defaults>
</compile_context>

<pallas_src>
import functools

import jax
import jax.numpy as jnp
from jax.experimental import pallas as pl
from jax.experimental.pallas import tpu as pltpu


def _cdiv(a: int, b: int) -> int:
    return -(-a // b)


def _tv_kernel(x_ref, out_ref, mask_h_ref, mask_w_ref, *, img_h: int, img_w: int):
    """One grid step: accumulate the per-image TV map into out_ref.

    x_ref:    (TB, SUB, H*W)  input images, lane axis = flattened (H, W)
    out_ref:  (1,  SUB, H*W)  f32 accumulator (same block across the i axis)
    mask_*:   (SUB, H*W)      f32 0/1 boundary masks, built once at i == 0
    """
    i = pl.program_id(1)
    sub, hw = mask_h_ref.shape

    @pl.when(i == 0)
    def _():
        col = jax.lax.broadcasted_iota(jnp.int32, (sub, hw), 1)
        if img_w & (img_w - 1) == 0:              # power-of-two width: cheap AND
            col_in_row = jnp.bitwise_and(col, img_w - 1)
        else:
            col_in_row = col % img_w
        # mask_w zeroes dw on each image's last column (including the lane-roll
        # wrap at the end of the packed row); mask_h zeroes dh on the last row.
        mask_w_ref[...] = (col_in_row < (img_w - 1)).astype(jnp.float32)
        mask_h_ref[...] = (col < (img_h - 1) * img_w).astype(jnp.float32)
        out_ref[...] = jnp.zeros_like(out_ref)

    x = x_ref[...].astype(jnp.float32)                     # (TB, SUB, HW)
    # Forward differences as lane rotations (XLU).  A shift of (n - k) is the
    # cyclic equivalent of -k; wrapped positions are zeroed by the masks.
    x_right = pltpu.roll(x, shift=hw - 1, axis=2)          # x[..., c + 1]
    x_down = pltpu.roll(x, shift=hw - img_w, axis=2)       # x[..., c + W]
    dh = x_down - x
    dw = x_right - x
    tv = jnp.sqrt(dh * dh * mask_h_ref[...]
                  + dw * dw * mask_w_ref[...]
                  + jnp.float32(1e-8))
    # Reduce only over the leading (group) axis per step: pure VALU adds into
    # the resident output block; full reduction happens in the wrapper.
    out_ref[...] += jnp.sum(tv, axis=0, keepdims=True)


def total_variation(x: jax.Array, lambda_reg: float = 1.0,
                    max_block_bytes=None) -> jax.Array:
    """Isotropic TV penalty.  Accepts (H, W), (C, H, W) or (B, C, H, W)."""
    if x.ndim == 2:
        x = x[None, None]
    elif x.ndim == 3:
        x = x[None]
    assert x.ndim == 4, x.shape
    B, C, H, W = x.shape
    N = B * C
    HW = H * W

    itemsize = jnp.dtype(x.dtype).itemsize
    SUB = 16 if itemsize == 2 else 8            # images per sublane group

    # --- VMEM budget (generation-aware; v7x has 64 MiB/TC vs 128 MiB) -------
    try:
        vmem_cap = int(pltpu.get_tpu_info().vmem_capacity_bytes)
    except Exception:                            # query unavailable: assume smallest
        vmem_cap = 64 * 1024 * 1024
    usable = (vmem_cap * 3) // 4                 # leave Mosaic-internal headroom

    hw_pad = _cdiv(HW, 128) * 128                # lane-padded row length in VMEM
    group_in_bytes = SUB * hw_pad * itemsize     # one (SUB, HW) input group
    group_f32_bytes = SUB * hw_pad * 4
    mask_bytes = 2 * group_f32_bytes             # mask_h + mask_w scratch
    out_bytes = group_f32_bytes                  # resident accumulator block
    # Whole-block math materializes a handful of full-block f32 temporaries
    # (upcast x, two rolled copies, dh/dw, tv): budget ~6 of them plus the
    # double-buffered input block.
    per_group_working = 2 * group_in_bytes + 6 * group_f32_bytes
    avail = usable - mask_bytes - out_bytes - (2 << 20)
    tb_budget = max(1, avail // per_group_working)
    cap_bytes = (16 << 20) if max_block_bytes is None else max_block_bytes
    tb_cap = max(1, cap_bytes // group_in_bytes)
    # TODO(synk): single images whose (SUB, H*W) working set exceeds VMEM
    # (roughly > 450x450 f32 on v7x) need an extra H*W-chunking grid axis with
    # a one-row halo; not implemented here.

    groups_total = _cdiv(N, SUB)
    TB = int(max(1, min(tb_budget, tb_cap, groups_total)))
    blocks_total = _cdiv(groups_total, TB)
    NC = 2 if blocks_total >= 2 else 1           # block-granular 2-partial split
    steps = _cdiv(blocks_total, NC)
    groups_pad = NC * steps * TB
    n_pad_imgs = groups_pad * SUB - N

    x2 = x.reshape(N, HW)                        # contiguous: free reshape
    if n_pad_imgs:
        x2 = jnp.pad(x2, ((0, n_pad_imgs), (0, 0)))
    x3 = x2.reshape(groups_pad, SUB, HW)

    kernel = functools.partial(_tv_kernel, img_h=H, img_w=W)
    out = pl.pallas_call(
        kernel,
        out_shape=jax.ShapeDtypeStruct((NC, SUB, HW), jnp.float32),
        grid_spec=pltpu.PrefetchScalarGridSpec(
            num_scalar_prefetch=0,
            grid=(NC, steps),
            in_specs=[pl.BlockSpec((TB, SUB, HW),
                                   lambda c, i: (c * steps + i, 0, 0))],
            out_specs=pl.BlockSpec((1, SUB, HW), lambda c, i: (c, 0, 0)),
            scratch_shapes=[
                pltpu.VMEM((SUB, HW), jnp.float32),   # mask_h
                pltpu.VMEM((SUB, HW), jnp.float32),   # mask_w
            ],
        ),
        compiler_params=pltpu.CompilerParams(
            # Leading axis: independent per-core partials (megacore on v7x;
            # harmless serial loop on 1-TC chips).  Trailing axis: reduction
            # into the resident output block.
            # TODO(synk): if xprof shows only one v7x TensorCore busy, switch
            # the leading axis to pltpu.CORE_PARALLEL / pl.core_map.
            dimension_semantics=("parallel", "arbitrary"),
            vmem_limit_bytes=int(usable),
        ),
    )(x3)

    total = jnp.sum(out, dtype=jnp.float32)
    if n_pad_imgs:
        # Every zero-padded image contributes exactly H*W*sqrt(1e-8) (its
        # dh/dw are zero, only eps survives the sqrt) — cancel it.
        total = total - jnp.sqrt(jnp.float32(1e-8)) * jnp.float32(n_pad_imgs * HW)
    return (jnp.float32(lambda_reg) * total).astype(jnp.float32)


def _tv_reference(x: jax.Array, lambda_reg: float = 1.0) -> jax.Array:
    """Pure-JAX reference mirroring the PyTorch forward exactly."""
    if x.ndim == 2:
        x = x[None, None]
    elif x.ndim == 3:
        x = x[None]
    x = x.astype(jnp.float32)
    dh = x[..., 1:, :] - x[..., :-1, :]
    dw = x[..., :, 1:] - x[..., :, :-1]
    dh = jnp.pad(dh, ((0, 0), (0, 0), (0, 1), (0, 0)))
    dw = jnp.pad(dw, ((0, 0), (0, 0), (0, 0), (0, 1)))
    return lambda_reg * jnp.sqrt(dh ** 2 + dw ** 2 + 1e-8).sum()


if __name__ == "__main__":
    root = jax.random.PRNGKey(0)
    k0, k1, k2 = jax.random.split(root, 3)
    lam = 1.0  # matches TotalVariationRegularizer(lambda_reg=1.0)

    # (B, C, H, W) forward, as in the PyTorch module.
    x4 = jax.random.normal(k0, (2, 4, 16, 16), dtype=jnp.float32)
    got = jax.block_until_ready(total_variation(x4, lam))
    want = jax.block_until_ready(_tv_reference(x4, lam))
    assert jnp.allclose(got, want, rtol=1e-4, atol=1e-2), (got, want)

    # (C, H, W) input with C not a multiple of 8: exercises zero-image padding
    # plus the analytic eps correction.
    x3d = jax.random.normal(k1, (3, 16, 16), dtype=jnp.float32)
    got3 = jax.block_until_ready(total_variation(x3d, lam))
    want3 = jax.block_until_ready(_tv_reference(x3d, lam))
    assert jnp.allclose(got3, want3, rtol=1e-4, atol=1e-2), (got3, want3)

    # Tiny block cap forces the multi-block / two-partial grid path.
    x5 = jax.random.normal(k2, (2, 5, 16, 16), dtype=jnp.float32)
    got5 = jax.block_until_ready(total_variation(x5, lam, max_block_bytes=1))
    want5 = jax.block_until_ready(_tv_reference(x5, lam))
    assert jnp.allclose(got5, want5, rtol=1e-4, atol=1e-2), (got5, want5)

    print("KERNEL_OK")
</pallas_src>

<mosaic_0001>
module attributes {stable_mosaic.version = 11 : i64} {
  func.func @_tv_kernel(%arg0: i32, %arg1: i32, %arg2: memref<1x8x256xf32, #tpu.memory_space<vmem>>, %arg3: memref<1x8x256xf32, #tpu.memory_space<vmem>>, %arg4: memref<8x256xf32, #tpu.memory_space<vmem>>, %arg5: memref<8x256xf32, #tpu.memory_space<vmem>>) attributes {dimension_semantics = [#tpu.dimension_semantics<parallel>, #tpu.dimension_semantics<arbitrary>], iteration_bounds = array<i64: 1, 1>, scalar_prefetch = 0 : i64, scratch_operands = 2 : i64, tpu.core_type = #tpu.core_type<tc>, window_params = [{transform_indices = @transform_0, window_bounds = array<i64: 1, 8, 256>}, {transform_indices = @transform_1, window_bounds = array<i64: 1, 8, 256>}]} {
    %c0_i32 = arith.constant 0 : i32
    %0 = arith.cmpi eq, %arg1, %c0_i32 : i32
    %1 = arith.extui %0 : i1 to i32
    %c0_i32_0 = arith.constant 0 : i32
    %2 = arith.cmpi ne, %1, %c0_i32_0 : i32
    scf.if %2 {
      %25 = tpu.iota {dimensions = array<i32: 1>} : vector<8x256xi32>
      %c15_i32 = arith.constant 15 : i32
      %26 = vector.broadcast %c15_i32 : i32 to vector<8x256xi32>
      %27 = arith.andi %25, %26 : vector<8x256xi32>
      %c15_i32_14 = arith.constant 15 : i32
      %28 = vector.broadcast %c15_i32_14 : i32 to vector<8x256xi32>
      %29 = arith.cmpi slt, %27, %28 : vector<8x256xi32>
      %30 = arith.extui %29 : vector<8x256xi1> to vector<8x256xi32>
      %31 = arith.sitofp %30 : vector<8x256xi32> to vector<8x256xf32>
      %c0_15 = arith.constant 0 : index
      %c0_16 = arith.constant 0 : index
      %32 = vector.load %arg5[%c0_15, %c0_16] : memref<8x256xf32, #tpu.memory_space<vmem>>, vector<8x256xf32>
      tpu.vector_store %arg5[%c0_15, %c0_16], %31 {strides = array<i32>} : memref<8x256xf32, #tpu.memory_space<vmem>>, vector<8x256xf32>,
      %c240_i32_17 = arith.constant 240 : i32
      %33 = vector.broadcast %c240_i32_17 : i32 to vector<8x256xi32>
      %34 = arith.cmpi slt, %25, %33 : vector<8x256xi32>
      %35 = arith.extui %34 : vector<8x256xi1> to vector<8x256xi32>
      %36 = arith.sitofp %35 : vector<8x256xi32> to vector<8x256xf32>
      %c0_18 = arith.constant 0 : index
      %c0_19 = arith.constant 0 : index
      %37 = vector.load %arg4[%c0_18, %c0_19] : memref<8x256xf32, #tpu.memory_space<vmem>>, vector<8x256xf32>
      tpu.vector_store %arg4[%c0_18, %c0_19], %36 {strides = array<i32>} : memref<8x256xf32, #tpu.memory_space<vmem>>, vector<8x256xf32>,
      %cst_20 = arith.constant 0.000000e+00 : f32
      %38 = vector.broadcast %cst_20 : f32 to vector<1x8x256xf32>
      %c0_21 = arith.constant 0 : index
      %c0_22 = arith.constant 0 : index
      %c0_23 = arith.constant 0 : index
      %39 = vector.load %arg3[%c0_21, %c0_22, %c0_23] : memref<1x8x256xf32, #tpu.memory_space<vmem>>, vector<1x8x256xf32>
      tpu.vector_store %arg3[%c0_21, %c0_22, %c0_23], %38 {strides = array<i32>} : memref<1x8x256xf32, #tpu.memory_space<vmem>>, vector<1x8x256xf32>,
    } else {
    }
    %c0 = arith.constant 0 : index
    %c0_1 = arith.constant 0 : index
    %c0_2 = arith.constant 0 : index
    %3 = vector.load %arg2[%c0, %c0_1, %c0_2] : memref<1x8x256xf32, #tpu.memory_space<vmem>>, vector<1x8x256xf32>
    %c255_i32 = arith.constant 255 : i32
    %4 = tpu.dynamic_rotate %3 by %c255_i32 dim 2 : vector<1x8x256xf32>, i32 -> vector<1x8x256xf32>
    %c240_i32 = arith.constant 240 : i32
    %5 = tpu.dynamic_rotate %3 by %c240_i32 dim 2 : vector<1x8x256xf32>, i32 -> vector<1x8x256xf32>
    %6 = arith.subf %5, %3 : vector<1x8x256xf32>
    %7 = arith.subf %4, %3 : vector<1x8x256xf32>
    %8 = arith.mulf %6, %6 : vector<1x8x256xf32>
    %c0_3 = arith.constant 0 : index
    %c0_4 = arith.constant 0 : index
    %9 = vector.load %arg4[%c0_3, %c0_4] : memref<8x256xf32, #tpu.memory_space<vmem>>, vector<8x256xf32>
    %10 = vector.shape_cast %9 : vector<8x256xf32> to vector<1x8x256xf32>
    %11 = arith.mulf %8, %10 : vector<1x8x256xf32>
    %12 = arith.mulf %7, %7 : vector<1x8x256xf32>
    %c0_5 = arith.constant 0 : index
    %c0_6 = arith.constant 0 : index
    %13 = vector.load %arg5[%c0_5, %c0_6] : memref<8x256xf32, #tpu.memory_space<vmem>>, vector<8x256xf32>
    %14 = vector.shape_cast %13 : vector<8x256xf32> to vector<1x8x256xf32>
    %15 = arith.mulf %12, %14 : vector<1x8x256xf32>
    %16 = arith.addf %11, %15 : vector<1x8x256xf32>
    %cst = arith.constant 9.99999993E-9 : f32
    %17 = vector.broadcast %cst : f32 to vector<1x8x256xf32>
    %18 = arith.addf %16, %17 : vector<1x8x256xf32>
    %19 = math.sqrt %18 : vector<1x8x256xf32>
    %c0_7 = arith.constant 0 : index
    %c0_8 = arith.constant 0 : index
    %c0_9 = arith.constant 0 : index
    %20 = vector.load %arg3[%c0_7, %c0_8, %c0_9] : memref<1x8x256xf32, #tpu.memory_space<vmem>>, vector<1x8x256xf32>
    %cst_10 = arith.constant dense<0.000000e+00> : vector<8x256xf32>
    %21 = vector.multi_reduction <add>, %19, %cst_10 [0] : vector<1x8x256xf32> to vector<8x256xf32>
    %22 = vector.shape_cast %21 : vector<8x256xf32> to vector<1x8x256xf32>
    %23 = arith.addf %20, %22 : vector<1x8x256xf32>
    %c0_11 = arith.constant 0 : index
    %c0_12 = arith.constant 0 : index
    %c0_13 = arith.constant 0 : index
    %24 = vector.load %arg3[%c0_11, %c0_12, %c0_13] : memref<1x8x256xf32, #tpu.memory_space<vmem>>, vector<1x8x256xf32>
    tpu.vector_store %arg3[%c0_11, %c0_12, %c0_13], %23 {strides = array<i32>} : memref<1x8x256xf32, #tpu.memory_space<vmem>>, vector<1x8x256xf32>,
    return
  }
  func.func @transform_0(%arg0: i32, %arg1: i32) -> (i32, i32, i32) {
    %c1_i32 = arith.constant 1 : i32
    %0 = arith.muli %arg0, %c1_i32 : i32
    %1 = arith.addi %0, %arg1 : i32
    %c0_i32 = arith.constant 0 : i32
    %c0_i32_0 = arith.constant 0 : i32
    %c0_i32_1 = arith.constant 0 : i32
    return %1, %c0_i32, %c0_i32_0 : i32, i32, i32
  }
  func.func @transform_1(%arg0: i32, %arg1: i32) -> (i32, i32, i32) {
    %c0_i32 = arith.constant 0 : i32
    %c0_i32_0 = arith.constant 0 : i32
    %c0_i32_1 = arith.constant 0 : i32
    return %arg0, %c0_i32, %c0_i32_0 : i32, i32, i32
  }
}

</mosaic_0001>

<bundles_post_ra>
// kernel: tpu_custom_call.1
= control target key start
LH: loop header
LB: loop body
LE: loop exit
PB: predicated region body
PF: predicated region fallthrough
CT: control target
= control target key end

     0   :  { %6 = vsyncpa [#allocation5], 0  ;;  %s205_s0 = inlined_call_operand.hbm [shape: f32[1,8,256], index: 0, kind: input, shape index: {}]   ;;  %s206_s1 = inlined_call_operand.hbm [shape: f32[1,8,256], index: 1, kind: output, shape index: {}]  }
   0x1   :  { %7 = vsyncpa [#allocation6], 0  ;;  %s184_s6 = smov [#allocation4]  }
   0x2   :  { %s18_s7 = sshll.u32 %s184_s6, 4  ;;  %s19_s7 = int_to_ptr.vmem [resolvable:$true] %s18_s7 }
   0x3   :  { %s148_s8 = scalar_lea.vmem %s19_s7, 256  ;;  %p153_p1 = scmp.lt.s32.totalorder %s19_s7, %s19_s7 }
   0x4   :  { %p149_p0 = scmp.ne.s32.totalorder %s19_s7, %s148_s8  ;;  %p154_p2 = scmp.lt.s32.totalorder %s148_s8, %s148_s8 }
   0x6   :  { %p155_p3 = por %p154_p2, %p153_p1 }
   0x8   :  { %p156_p4 = pnand %p155_p3, %p149_p0 }
   0xa   :  { %159 = shalt.err (!%p156_p4)
}
   0xb   :  { %21 = dma.hbm_to_vmem [thread:$0]  %s205_s0, 256, %s19_s7, [#allocation5]  }
   0xc   :  { %180 = dma.done.wait [#allocation5], 256  }
   0xd   :  { %181 = vsyncadd [#allocation5], 4294967040  ;;  %v53_v0 = vld [vmem:[#allocation4] sm:$0xff]  ;;  %s185_s11 = smov 112   ;;  %s186_s12 = smov 127   ;;  %v54_v1 = vld [vmem:[#allocation4 + $0x8] sm:$0xff]  ;;  %v30_v2 = vlaneseq }
   0xe   :  { %64 = vrot.lane.b32.xlu1 %v53_v0, %s185_s11  ;;  %55 = vrot.lane.b32.xlu0 %v53_v0, %s186_s12  ;;  %v187_v19 = vmov 0.0   ;;  %s188_s0 = smov [#allocation7]  }
   0xf   :  { %v31_v3 = vand.u32 127, %v30_v2  ;;  %s119_s13 = sshll.u32 %s188_s0, 4  ;;  %s120_s13 = int_to_ptr.vmem [resolvable:$true] %s119_s13 }
  0x10   :  { %s160_s14 = scalar_lea.vmem %s120_s13, 256  ;;  %p165_p6 = scmp.lt.s32.totalorder %s120_s13, %s120_s13 }
  0x11   :  { %v32_v4 = vadd.s32 128, %v31_v3  ;;  %v33_v7 = vand.u32 15, %v31_v3  ;;  %vm68_vm0 = vcmp.lt.s32.totalorder %v31_v3, 112  ;;  %vm61_vm1 = vcmp.lt.s32.totalorder %v31_v3, 127  ;;  %p161_p5 = scmp.ne.s32.totalorder %s120_s13, %s160_s14  ;;  %p166_p7 = scmp.lt.s32.totalorder %s160_s14, %s160_s14 }
  0x12   :  { %66 = vrot.lane.b32.xlu1 %v54_v1, %s185_s11  ;;  %57 = vrot.lane.b32.xlu0 %v54_v1, %s186_s12 }
  0x13   :  { %v34_v8 = vand.u32 15, %v32_v4  ;;  %vm44_vm2 = vcmp.lt.s32.totalorder %v32_v4, 240  ;;  %vm35_vm3 = vcmp.lt.s32.totalorder %v33_v7, 15  ;;  %p167_p8 = por %p166_p7, %p165_p6 }
  0x14   :  { %v130_v20 = vsel %vm44_vm2, 1.0, %v187_v19  ;;  %v128_v21 = vsel %vm35_vm3, 1.0, %v187_v19 }
  0x15   :  { %vm36_vm4 = vcmp.lt.s32.totalorder %v34_v8, 15  ;;  %p168_p9 = pnand %p167_p8, %p161_p5 }
  0x16   :  { %v129_v22 = vsel %vm36_vm4, 1.0, %v187_v19 }
  0x80   :  { %v65_v5 = vpop.permute.xlu1 %64  ;;  %v56_v6 = vpop.permute.xlu0 %55 }
  0x84   :  { %v67_v9 = vpop.permute.xlu1 %66  ;;  %v58_v10 = vpop.permute.xlu0 %57 }
  0x85   :  { %v69_v11 = vsel %vm68_vm0, %v65_v5, %v67_v9  ;;  %v70_v12 = vsel %vm68_vm0, %v67_v9, %v65_v5  ;;  %v62_v13 = vsel %vm61_vm1, %v56_v6, %v58_v10  ;;  %v63_v14 = vsel %vm61_vm1, %v58_v10, %v56_v6 }
  0x86   :  { %v71_v15 = vsub.f32 %v69_v11, %v53_v0  ;;  %v72_v16 = vsub.f32 %v70_v12, %v54_v1  ;;  %v73_v17 = vsub.f32 %v62_v13, %v53_v0  ;;  %v74_v18 = vsub.f32 %v63_v14, %v54_v1 }
  0x88   :  { %v76_v23 = vmul.f32 %v72_v16, %v72_v16  ;;  %v81_v24 = vmul.f32 %v73_v17, %v73_v17  ;;  %v82_v25 = vmul.f32 %v74_v18, %v74_v18  ;;  %v75_v26 = vmul.f32 %v71_v15, %v71_v15 }
  0x8a   :  { %v80_v27 = vmul.f32 %v130_v20, %v76_v23  ;;  %v85_v28 = vmul.f32 %v128_v21, %v81_v24  ;;  %v86_v29 = vmul.f32 %v129_v22, %v82_v25 }
  0x8c   :  { %v87_v30 = vadd.f32 %v85_v28, %v75_v26  ;;  %v88_v31 = vadd.f32 %v86_v29, %v80_v27 }
  0x8e   :  { %v89_v32 = vadd.f32 1e-08, %v87_v30  ;;  %v90_v33 = vadd.f32 1e-08, %v88_v31 }
  0x90   :  { %136 = vrsqrt.f32 %v89_v32  ;;  %vm93_vm5 = vcmp.eq.f32.partialorder %v89_v32, inf  ;;  %v96_v37 = vand.u32 2147483648, %v89_v32  ;;  %vm95_vm6 = vcmp.eq.f32.partialorder %v89_v32, 0.0 }
  0x91   :  { %138 = vrsqrt.f32 %v90_v33  ;;  %vm100_vm7 = vcmp.eq.f32.partialorder %v90_v33, inf  ;;  %v103_v40 = vand.u32 2147483648, %v90_v33  ;;  %vm102_vm8 = vcmp.eq.f32.partialorder %v90_v33, 0.0 }
  0x9d   :  { %v137_v34 = vpop.eup %136 }
  0x9e   :  { %v139_v35 = vpop.eup %138  ;;  %v92_v36 = vmul.f32 %v137_v34, %v89_v32 }
  0x9f   :  { %v99_v38 = vmul.f32 %v139_v35, %v90_v33 }
  0xa0   :  { %v94_v39 = vsel %vm93_vm5, %v89_v32, %v92_v36 }
  0xa1   :  { %v97_v41 = vsel %vm95_vm6, %v96_v37, %v94_v39  ;;  %v101_v42 = vsel %vm100_vm7, %v90_v33, %v99_v38 }
  0xa2   :  { %v104_v43 = vsel %vm102_vm8, %v103_v40, %v101_v42  ;;  %111 = vst [vmem:[#allocation7] sm:$0xff] %v97_v41 }
  0xa3   :  { %112 = vst [vmem:[#allocation7 + $0x8] sm:$0xff] %v104_v43 }
  0xa4   :  { %171 = shalt.err (!%p168_p9)
}
  0xa5   :  { %122 = dma.vmem_to_hbm [thread:$0]  %s120_s13, 256, %s206_s1, [#allocation6]  }
  0xa6   :  { %182 = dma.done.wait [#allocation6], 256  }
  0xa7   :  { %183 = vsyncadd [#allocation6], 4294967040 }
  0xa8   :  { %126 = vsyncpa [#allocation5], 1 }
  0xa9   :  { %127 = vsyncpa [#allocation6], 1 }

</bundles_post_ra>
